<compile_context>
chip_gen: v5e
topology: v5e:2x2
jax: 0.10.0
libtpu: 0.0.40
codegen_flags: <defaults>
</compile_context>

<pallas_src>
import re
from functools import partial

import numpy as np
import jax
import jax.numpy as jnp
from jax import lax
from jax.experimental import pallas as pl
from jax.experimental.pallas import tpu as pltpu

LN_EPS = 1e-5
CONV_C_OUT = 37
CONV_K = 20
CONV_STRIDE = 4
CONV_PAD = 5
HIDDEN_N = 198                                          # 37 * 48 = 1776 forces n = 198
PADDED_LEN = HIDDEN_N + 2 * CONV_PAD                    # 208
CONV_L_OUT = (PADDED_LEN - CONV_K) // CONV_STRIDE + 1   # 48
FLAT_DIM = CONV_C_OUT * CONV_L_OUT                      # 1776
FLAT_PAD = 1792                                         # 14 * 128, lane-aligned
TWO_PI = 2.0 * np.pi


def _cdiv(a, b):
    return (a + b - 1) // b


def _round_up(x, m):
    return _cdiv(x, m) * m


def _tpu_generation():
    """Best-effort TPU generation from device_kind (5 = v5e, 6 = v6e, 7 = v7x)."""
    try:
        kind = jax.devices()[0].device_kind.lower()
    except Exception:
        return 0
    m = re.search(r"v(\d+)", kind)
    return int(m.group(1)) if m else 0


def _tile_config(B, gen):
    """(TB, vmem_limit_bytes) per generation; ensures >=2 grid programs on v7x."""
    if gen >= 7:
        tb_cap, min_programs, vmem = 1024, 2, 48 << 20   # 64 MiB VMEM per core
    elif gen == 6:
        tb_cap, min_programs, vmem = 2048, 1, 96 << 20   # 128 MiB VMEM
    elif gen == 5:
        tb_cap, min_programs, vmem = 512, 1, 48 << 20    # raise 16 MiB scoped default
    else:
        tb_cap, min_programs, vmem = 512, 1, None
    if B <= 8 or (min_programs <= 1 and B <= tb_cap):
        return B, vmem                                   # single full-extent block
    tb = max(8, min(tb_cap, _round_up(_cdiv(B, min_programs), 8)))
    return tb, vmem


def network3_kernel(x_ref, wbig_ref, bbig_ref, w3_ref, b3_ref, o_ref, *, act_dtype):
    x = x_ref[...].astype(jnp.float32)                           # (TB, D)

    # LayerNorm statistics, one-pass variance (affine gamma/beta folded into wbig).
    mean = jnp.mean(x, axis=-1, keepdims=True)
    var = jnp.maximum(jnp.mean(x * x, axis=-1, keepdims=True) - mean * mean, 0.0)
    xn = (x - mean) * lax.rsqrt(var + LN_EPS)

    # Fused (LN affine + Linear1 + zero-pad + Conv1d), pre-scaled by 0.5 so that
    # z here is z_orig/2.  bf16 operands at the dot, f32 accumulation.
    z = jnp.dot(xn.astype(jnp.bfloat16), wbig_ref[...],
                preferred_element_type=jnp.float32) + bbig_ref[...]      # (TB, 1792)

    # Mid sigmoid rewritten as tanh (1 EUP op/elem); the 0.5*t + 0.5 is folded
    # into w3/b3 offline.  bf16 on v6e/v7x, f32 on v5e.
    t = jnp.tanh(z.astype(act_dtype))

    # Linear(1776 -> out) with the folded constants, lane-padded 128-wide output.
    y = jnp.dot(t.astype(jnp.bfloat16), w3_ref[...],
                preferred_element_type=jnp.float32) + b3_ref[...]        # (TB, OUT_PAD)

    o_ref[...] = jax.nn.sigmoid(y) * TWO_PI


def build_conv_patch_matrix(conv_w):
    """conv_w: (37, 1, 20) -> M: (208, 1776) with M[l*4 + k, c*48 + l] = w[c, 0, k]."""
    conv_w = np.asarray(conv_w, dtype=np.float32)
    M = np.zeros((PADDED_LEN, FLAT_DIM), dtype=np.float32)
    for c in range(CONV_C_OUT):
        for l in range(CONV_L_OUT):
            start = l * CONV_STRIDE
            M[start:start + CONV_K, c * CONV_L_OUT + l] = conv_w[c, 0, :]
    return M


def prepare_params(params):
    """One-time host-side fusion + tanh constant folding + padding + bf16 cast."""
    w1 = np.asarray(params["w1"], np.float32)            # (D, 198)
    b1 = np.asarray(params["b1"], np.float32)            # (198,)
    gamma = np.asarray(params["ln_gamma"], np.float32)   # (D,)
    beta = np.asarray(params["ln_beta"], np.float32)     # (D,)
    w3 = np.asarray(params["w3"], np.float32)            # (1776, out)
    b3 = np.asarray(params["b3"], np.float32)            # (out,)
    D = w1.shape[0]
    out_dim = w3.shape[1]

    # Zero-padded linear_1 so its output is already the padded conv input (length 208).
    w1p = np.zeros((D, PADDED_LEN), np.float32)
    w1p[:, CONV_PAD:CONV_PAD + HIDDEN_N] = w1
    b1p = np.zeros((PADDED_LEN,), np.float32)
    b1p[CONV_PAD:CONV_PAD + HIDDEN_N] = b1

    M = build_conv_patch_matrix(params["conv_w"])                          # (208, 1776)
    cb = np.repeat(np.asarray(params["conv_b"], np.float32), CONV_L_OUT)   # (1776,)

    # Algebraic fusion:  (xn*g + beta) @ W1p @ M + b1p @ M + cb == xn @ W_big + b_big
    w1m = w1p @ M                                   # (D, 1776)
    w_big = gamma[:, None] * w1m                    # diag(g) @ W1p @ M
    b_big = beta @ w1m + b1p @ M + cb               # (1776,)

    # sigmoid(z) = 0.5*tanh(z/2) + 0.5  -> halve w_big/b_big, fold the rest into w3/b3.
    w_big *= 0.5
    b_big *= 0.5
    w3_fold = 0.5 * w3                              # (1776, out)
    b3_fold = b3 + 0.5 * w3.sum(axis=0)             # sum over the real 1776 rows only

    # Lane padding: 1776 -> 1792, output_size -> multiple of 128 (no wider).
    out_pad = _round_up(out_dim, 128)
    w_big_p = np.zeros((D, FLAT_PAD), np.float32)
    w_big_p[:, :FLAT_DIM] = w_big
    b_big_p = np.zeros((1, FLAT_PAD), np.float32)
    b_big_p[0, :FLAT_DIM] = b_big
    w3_p = np.zeros((FLAT_PAD, out_pad), np.float32)
    w3_p[:FLAT_DIM, :out_dim] = w3_fold
    b3_p = np.zeros((1, out_pad), np.float32)
    b3_p[0, :out_dim] = b3_fold

    return dict(
        w_big=jnp.asarray(w_big_p, jnp.bfloat16),   # bf16 MXU operands, f32 accumulation
        b_big=jnp.asarray(b_big_p, jnp.float32),
        w3=jnp.asarray(w3_p, jnp.bfloat16),
        b3=jnp.asarray(b3_p, jnp.float32),
        out_dim=out_dim,
    )


@partial(jax.jit, static_argnames=("out_dim",))
def _forward_impl(x, w_big, b_big, w3, b3, *, out_dim):
    B, D = x.shape
    flat_pad = w_big.shape[1]
    out_pad = w3.shape[1]

    gen = _tpu_generation()
    TB, vmem_limit = _tile_config(B, gen)
    # bf16 EUP/VPU only on v6e/v7x; keep f32 nonlinearity on v5e/unknown.
    act_dtype = jnp.bfloat16 if gen >= 6 else jnp.float32

    grid = (pl.cdiv(B, TB),)   # partial last block instead of a wrapper-side jnp.pad

    out = pl.pallas_call(
        partial(network3_kernel, act_dtype=act_dtype),
        out_shape=jax.ShapeDtypeStruct((B, out_pad), jnp.float32),
        grid=grid,
        in_specs=[
            pl.BlockSpec((TB, D), lambda i: (i, 0)),            # batch tile of x
            pl.BlockSpec((D, flat_pad), lambda i: (0, 0)),      # weights VMEM-resident
            pl.BlockSpec((1, flat_pad), lambda i: (0, 0)),
            pl.BlockSpec((flat_pad, out_pad), lambda i: (0, 0)),
            pl.BlockSpec((1, out_pad), lambda i: (0, 0)),
        ],
        out_specs=pl.BlockSpec((TB, out_pad), lambda i: (i, 0)),  # lane-dense output
        compiler_params=pltpu.CompilerParams(
            dimension_semantics=("parallel",),                    # megacore over batch
            vmem_limit_bytes=vmem_limit),
    )(x, w_big, b_big, w3, b3)
    return out[:, :out_dim]


def network_3_forward(x, fused):
    return _forward_impl(x, fused["w_big"], fused["b_big"], fused["w3"],
                         fused["b3"], out_dim=fused["out_dim"])


def init_params(key, input_size, output_size):
    """Deterministic params with PyTorch-default-style shapes/scales."""
    ks = jax.random.split(key, 6)
    n = HIDDEN_N
    ln_gamma = jnp.ones((input_size,), jnp.float32)
    ln_beta = jnp.zeros((input_size,), jnp.float32)
    bound1 = 1.0 / np.sqrt(input_size)
    w1 = jax.random.uniform(ks[0], (input_size, n), jnp.float32, -bound1, bound1)
    b1 = jax.random.uniform(ks[1], (n,), jnp.float32, -bound1, bound1)
    boundc = 1.0 / np.sqrt(1 * CONV_K)
    conv_w = jax.random.uniform(ks[2], (CONV_C_OUT, 1, CONV_K), jnp.float32, -boundc, boundc)
    conv_b = jax.random.uniform(ks[3], (CONV_C_OUT,), jnp.float32, -boundc, boundc)
    bound3 = 1.0 / np.sqrt(FLAT_DIM)
    w3 = jax.random.uniform(ks[4], (FLAT_DIM, output_size), jnp.float32, -bound3, bound3)
    b3 = jax.random.uniform(ks[5], (output_size,), jnp.float32, -bound3, bound3)
    return dict(ln_gamma=ln_gamma, ln_beta=ln_beta, w1=w1, b1=b1,
                conv_w=conv_w, conv_b=conv_b, w3=w3, b3=b3)


def network_3_reference(x, params):
    """Pure-JAX f32 reference mirroring the PyTorch forward (HIGHEST precision)."""
    hp = lax.Precision.HIGHEST
    x = x[:, None, :]                                            # unsqueeze(1)
    mean = jnp.mean(x, -1, keepdims=True)
    var = jnp.mean((x - mean) ** 2, -1, keepdims=True)
    x = (x - mean) / jnp.sqrt(var + LN_EPS) * params["ln_gamma"] + params["ln_beta"]
    x = jnp.matmul(x, params["w1"], precision=hp) + params["b1"]  # linear_1 (+LeakyReLU(1)=id)
    x = lax.conv_general_dilated(                                 # conv1d_1
        x, params["conv_w"], window_strides=(CONV_STRIDE,),
        padding=[(CONV_PAD, CONV_PAD)],
        dimension_numbers=("NCH", "OIH", "NCH"), precision=hp)
    x = jax.nn.sigmoid(x)
    x = x.reshape(x.shape[0], -1)                                 # flatten
    x = jnp.dot(x, params["w3"], precision=hp) + params["b3"]     # linear_3
    return jax.nn.sigmoid(x) * TWO_PI                             # squeeze is a shape no-op


if __name__ == "__main__":
    B, input_size, output_size = 2, 64, 10
    key = jax.random.PRNGKey(0)
    k_x, k_p = jax.random.split(key)
    x = jax.random.normal(k_x, (B, input_size), jnp.float32)
    params = init_params(k_p, input_size, output_size)

    fused = prepare_params(params)              # one-time, hoisted weight fusion/folding
    out = network_3_forward(x, fused)
    out = jax.block_until_ready(out)

    ref = network_3_reference(x, params)
    assert out.shape == (B, output_size)
    # bf16 MXU operands + bf16 tanh (v6e/v7x) + fused summation order => a few e-3..e-2
    # deviation on an output in [0, 2*pi]; tolerance sized accordingly.
    assert np.allclose(np.asarray(out), np.asarray(ref), atol=4e-2, rtol=4e-2)
    print("KERNEL_OK")
</pallas_src>

<mosaic_0001>
module attributes {stable_mosaic.version = 11 : i64} {
  func.func @network3_kernel(%arg0: i32, %arg1: memref<2x64xf32, #tpu.memory_space<vmem>>, %arg2: memref<64x1792xbf16, #tpu.memory_space<vmem>>, %arg3: memref<1x1792xf32, #tpu.memory_space<vmem>>, %arg4: memref<1792x128xbf16, #tpu.memory_space<vmem>>, %arg5: memref<1x128xf32, #tpu.memory_space<vmem>>, %arg6: memref<2x128xf32, #tpu.memory_space<vmem>>) attributes {dimension_semantics = [#tpu.dimension_semantics<parallel>], iteration_bounds = array<i64: 1>, scalar_prefetch = 0 : i64, scratch_operands = 0 : i64, tpu.core_type = #tpu.core_type<tc>, window_params = [{transform_indices = @transform_0, window_bounds = array<i64: 2, 64>}, {pipeline_mode = #tpu.pipeline_mode<synchronous>, transform_indices = @transform_1, window_bounds = array<i64: 64, 1792>}, {pipeline_mode = #tpu.pipeline_mode<synchronous>, transform_indices = @transform_2, window_bounds = array<i64: 1, 1792>}, {pipeline_mode = #tpu.pipeline_mode<synchronous>, transform_indices = @transform_3, window_bounds = array<i64: 1792, 128>}, {pipeline_mode = #tpu.pipeline_mode<synchronous>, transform_indices = @transform_4, window_bounds = array<i64: 1, 128>}, {transform_indices = @transform_5, window_bounds = array<i64: 2, 128>}]} {
    %c0 = arith.constant 0 : index
    %c0_0 = arith.constant 0 : index
    %0 = vector.load %arg1[%c0, %c0_0] : memref<2x64xf32, #tpu.memory_space<vmem>>, vector<2x64xf32>
    %cst = arith.constant dense<0.000000e+00> : vector<2xf32>
    %1 = vector.multi_reduction <add>, %0, %cst [1] : vector<2x64xf32> to vector<2xf32>
    %2 = vector.shape_cast %1 : vector<2xf32> to vector<2x1xf32>
    %cst_1 = arith.constant 6.400000e+01 : f32
    %3 = vector.broadcast %cst_1 : f32 to vector<2x1xf32>
    %4 = arith.divf %2, %3 : vector<2x1xf32>
    %5 = arith.mulf %0, %0 : vector<2x64xf32>
    %cst_2 = arith.constant dense<0.000000e+00> : vector<2xf32>
    %6 = vector.multi_reduction <add>, %5, %cst_2 [1] : vector<2x64xf32> to vector<2xf32>
    %7 = vector.shape_cast %6 : vector<2xf32> to vector<2x1xf32>
    %cst_3 = arith.constant 6.400000e+01 : f32
    %8 = vector.broadcast %cst_3 : f32 to vector<2x1xf32>
    %9 = arith.divf %7, %8 : vector<2x1xf32>
    %10 = arith.mulf %4, %4 : vector<2x1xf32>
    %11 = arith.subf %9, %10 : vector<2x1xf32>
    %cst_4 = arith.constant 0.000000e+00 : f32
    %12 = vector.broadcast %cst_4 : f32 to vector<2x1xf32>
    %13 = arith.maximumf %11, %12 : vector<2x1xf32>
    %14 = vector.broadcast %4 : vector<2x1xf32> to vector<2x64xf32>
    %15 = arith.subf %0, %14 : vector<2x64xf32>
    %cst_5 = arith.constant 9.99999974E-6 : f32
    %16 = vector.broadcast %cst_5 : f32 to vector<2x1xf32>
    %17 = arith.addf %13, %16 : vector<2x1xf32>
    %18 = math.rsqrt %17 : vector<2x1xf32>
    %19 = vector.broadcast %18 : vector<2x1xf32> to vector<2x64xf32>
    %20 = arith.mulf %15, %19 : vector<2x64xf32>
    %21 = arith.truncf %20 : vector<2x64xf32> to vector<2x64xbf16>
    %c0_6 = arith.constant 0 : index
    %c0_7 = arith.constant 0 : index
    %22 = vector.load %arg2[%c0_6, %c0_7] : memref<64x1792xbf16, #tpu.memory_space<vmem>>, vector<64x1792xbf16>
    %cst_8 = arith.constant dense<0.000000e+00> : vector<2x1792xf32>
    %23 = tpu.matmul %21, %22, %cst_8 {dimension_numbers = #tpu.dot_dimension_numbers<[1], [0], [0], [1], [0, 0, 1, 1], [], []>} : vector<2x64xbf16>, vector<64x1792xbf16>, vector<2x1792xf32> -> vector<2x1792xf32>
    %c0_9 = arith.constant 0 : index
    %c0_10 = arith.constant 0 : index
    %24 = vector.load %arg3[%c0_9, %c0_10] : memref<1x1792xf32, #tpu.memory_space<vmem>>, vector<1x1792xf32>
    %25 = vector.broadcast %24 : vector<1x1792xf32> to vector<2x1792xf32>
    %26 = arith.addf %23, %25 : vector<2x1792xf32>
    %27 = math.tanh %26 : vector<2x1792xf32>
    %28 = arith.truncf %27 : vector<2x1792xf32> to vector<2x1792xbf16>
    %c0_11 = arith.constant 0 : index
    %c0_12 = arith.constant 0 : index
    %29 = vector.load %arg4[%c0_11, %c0_12] : memref<1792x128xbf16, #tpu.memory_space<vmem>>, vector<1792x128xbf16>
    %cst_13 = arith.constant dense<0.000000e+00> : vector<2x128xf32>
    %30 = tpu.matmul %28, %29, %cst_13 {dimension_numbers = #tpu.dot_dimension_numbers<[1], [0], [0], [1], [0, 0, 1, 1], [], []>} : vector<2x1792xbf16>, vector<1792x128xbf16>, vector<2x128xf32> -> vector<2x128xf32>
    %c0_14 = arith.constant 0 : index
    %c0_15 = arith.constant 0 : index
    %31 = vector.load %arg5[%c0_14, %c0_15] : memref<1x128xf32, #tpu.memory_space<vmem>>, vector<1x128xf32>
    %32 = vector.broadcast %31 : vector<1x128xf32> to vector<2x128xf32>
    %33 = arith.addf %30, %32 : vector<2x128xf32>
    %34 = arith.negf %33 : vector<2x128xf32>
    %35 = math.exp %34 : vector<2x128xf32>
    %cst_16 = arith.constant 1.000000e+00 : f32
    %36 = vector.broadcast %cst_16 : f32 to vector<2x128xf32>
    %37 = arith.addf %36, %35 : vector<2x128xf32>
    %38 = arith.divf %36, %37 : vector<2x128xf32>
    %cst_17 = arith.constant 6.28318548 : f32
    %39 = vector.broadcast %cst_17 : f32 to vector<2x128xf32>
    %40 = arith.mulf %38, %39 : vector<2x128xf32>
    %c0_18 = arith.constant 0 : index
    %c0_19 = arith.constant 0 : index
    %41 = vector.load %arg6[%c0_18, %c0_19] : memref<2x128xf32, #tpu.memory_space<vmem>>, vector<2x128xf32>
    tpu.vector_store %arg6[%c0_18, %c0_19], %40 {strides = array<i32>} : memref<2x128xf32, #tpu.memory_space<vmem>>, vector<2x128xf32>,
    return
  }
  func.func @transform_0(%arg0: i32) -> (i32, i32) {
    %c0_i32 = arith.constant 0 : i32
    %c0_i32_0 = arith.constant 0 : i32
    return %arg0, %c0_i32 : i32, i32
  }
  func.func @transform_1(%arg0: i32) -> (i32, i32) {
    %c0_i32 = arith.constant 0 : i32
    %c0_i32_0 = arith.constant 0 : i32
    %c0_i32_1 = arith.constant 0 : i32
    return %c0_i32, %c0_i32_0 : i32, i32
  }
  func.func @transform_2(%arg0: i32) -> (i32, i32) {
    %c0_i32 = arith.constant 0 : i32
    %c0_i32_0 = arith.constant 0 : i32
    %c0_i32_1 = arith.constant 0 : i32
    return %c0_i32, %c0_i32_0 : i32, i32
  }
  func.func @transform_3(%arg0: i32) -> (i32, i32) {
    %c0_i32 = arith.constant 0 : i32
    %c0_i32_0 = arith.constant 0 : i32
    %c0_i32_1 = arith.constant 0 : i32
    return %c0_i32, %c0_i32_0 : i32, i32
  }
  func.func @transform_4(%arg0: i32) -> (i32, i32) {
    %c0_i32 = arith.constant 0 : i32
    %c0_i32_0 = arith.constant 0 : i32
    %c0_i32_1 = arith.constant 0 : i32
    return %c0_i32, %c0_i32_0 : i32, i32
  }
  func.func @transform_5(%arg0: i32) -> (i32, i32) {
    %c0_i32 = arith.constant 0 : i32
    %c0_i32_0 = arith.constant 0 : i32
    return %arg0, %c0_i32 : i32, i32
  }
}

</mosaic_0001>

<bundles_post_ra>
// kernel: _forward_impl.1
= control target key start
LH: loop header
LB: loop body
LE: loop exit
PB: predicated region body
PF: predicated region fallthrough
CT: control target
= control target key end

     0   :  { %10 = vsyncpa [#allocation3], 0  ;;  %s2967_s0 = inlined_call_operand.hbm [shape: f32[2,64], index: 0, kind: input, shape index: {}]   ;;  %s2968_s1 = inlined_call_operand.hbm [shape: bf16[64,1792], index: 1, kind: input, shape index: {}]   ;;  %s2969_s2 = inlined_call_operand.hbm [shape: f32[1,1792], index: 2, kind: input, shape index: {}]   ;;  %s2970_s3 = inlined_call_operand.hbm [shape: bf16[1792,128], index: 3, kind: input, shape index: {}]   ;;  %s2971_s4 = inlined_call_operand.vmem [shape: f32[1,128], index: 4, kind: input, shape index: {}]   ;;  %s2972_s5 = inlined_call_operand.hbm [shape: f32[2,128], index: 5, kind: output, shape index: {}]  }
   0x1   :  { %11 = vsyncpa [#allocation6], 0 }
   0x2   :  { %12 = vsyncpa [#allocation9], 0  ;;  %s29_s20 = sshll.u32 %s2968_s1, 4  ;;  %s30_s20 = int_to_ptr.hbm [resolvable:$true] %s29_s20 }
   0x3   :  { %13 = vsyncpa [#allocation4], 0  ;;  %s2850_s21 = smov [#allocation5]   ;;  %s19_s25 = sshll.u32 %s2967_s0, 4  ;;  %s20_s25 = int_to_ptr.hbm [resolvable:$true] %s19_s25 }
   0x4   :  { %s31_s22 = sshll.u32 %s2850_s21, 4  ;;  %s2851_s26 = smov 896   ;;  %s32_s22 = int_to_ptr.vmem [resolvable:$true] %s31_s22 }
   0x5   :  { %s2852_s27 = smov 56   ;;  %s2853_s28 = smov [#allocation2]  }
   0x6   :  { %37 = dma.hbm_to_vmem [thread:$0]  %s30_s20, 7168, %s32_s22, [#allocation6], %s2851_s26, %s2851_s26, %s2852_s27  }
   0x7   :  { %s21_s29 = sshll.u32 %s2853_s28, 4  ;;  %s43_s7 = sshll.u32 %s2969_s2, 4  ;;  %s22_s29 = int_to_ptr.vmem [resolvable:$true] %s21_s29  ;;  %s44_s7 = int_to_ptr.hbm [resolvable:$true] %s43_s7 }
   0x8   :  { %24 = dma.hbm_to_vmem [thread:$0]  %s20_s25, 32, %s22_s29, [#allocation3]  }
   0x9   :  { %s53_s9 = sshll.u32 %s2970_s3, 4  ;;  %s2854_s10 = smov [#allocation7]   ;;  %s54_s9 = int_to_ptr.hbm [resolvable:$true] %s53_s9 }
   0xa   :  { %s45_s11 = sshll.u32 %s2854_s10, 4  ;;  %s2855_s0 = smov [#allocation8]   ;;  %s46_s11 = int_to_ptr.vmem [resolvable:$true] %s45_s11 }
   0xb   :  { %48 = dma.hbm_to_vmem [thread:$0]  %s44_s7, 224, %s46_s11, [#allocation6]  }
   0xc   :  { %s55_s12 = sshll.u32 %s2855_s0, 4  ;;  %s2856_s13 = smov 64   ;;  %s56_s12 = int_to_ptr.vmem [resolvable:$true] %s55_s12 }
   0xd   :  { %s2857_s14 = smov 4  }
   0xe   :  { %61 = dma.hbm_to_vmem [thread:$0]  %s54_s9, 14336, %s56_s12, [#allocation9], %s2856_s13, %s2856_s13, %s2857_s14  }
   0xf   :  { %2842 = dma.done.wait [#allocation3], 32  }
  0x10   :  { %2843 = vsyncadd [#allocation3], 4294967264 }
  0x11   :  { %2844 = dma.done.wait [#allocation6], 7392  }
  0x12   :  { %2845 = vsyncadd [#allocation6], 4294959904 }
  0x13   :  { %2846 = dma.done.wait [#allocation9], 14336  }
  0x14   :  { %2847 = vsyncadd [#allocation9], 4294952960  ;;  %vm82_vm0 = vcmask 517120   ;;  %v2902_v0 = vld [vmem:[#allocation2] sm:$0x3]  ;;  %v2858_v4 = vmov 64.0  }
  0x15   :  { %v83_v1 = vsel %vm82_vm0, %v2902_v0, 0.0  ;;  %v94_v2 = vmul.f32 %v2902_v0, %v2902_v0  ;;  %2686 = vrcp.f32 %v2858_v4  ;;  %v1990_v8 = vld [vmem:[#allocation5 + $0x150] sm:$0xf]  ;;  %v2556_v9 = vld [vmem:[#allocation5 + $0x184] sm:$0xf0]  ;;  %vm484_vm5 = vcmask 523264  }
  0x16   :  { %84 = vadd.xlane.f32.xlu0 %v83_v1  ;;  %v2549_v10 = vld [vmem:[#allocation5 + $0x154] sm:$0xf]  ;;  %v1991_v11 = vor.u32 %v2556_v9, %v1990_v8  ;;  %v1992_v12 = vld [vmem:[#allocation5 + $0x188] sm:$0xf0]  ;;  %v1998_v13 = vld [vmem:[#allocation5 + $0x158] sm:$0xf] }
  0x17   :  { %v95_v3 = vsel %vm82_vm0, %v94_v2, 0.0  ;;  %v2557_v14 = vld [vmem:[#allocation5 + $0x18c] sm:$0xf0]  ;;  %v1995_v15 = vor.u32 %v2549_v10, %v1992_v12  ;;  %v2550_v17 = vld [vmem:[#allocation5 + $0x15c] sm:$0xf]  ;;  %s1808_s18 = sshll.u32 %s2972_s5, 4  ;;  %s1809_s18 = int_to_ptr.hbm [resolvable:$true] %s1808_s18 }
  0x18   :  { %v1999_v16 = vor.u32 %v2557_v14, %v1998_v13  ;;  %v2000_v18 = vld [vmem:[#allocation5 + $0x190] sm:$0xf0]  ;;  %492 = vmatpush.bf16.msra.mxu0 %v1991_v11  ;;  %v1934_v20 = vld [vmem:[#allocation5 + $0xe0] sm:$0xf]  ;;  %v2542_v21 = vld [vmem:[#allocation5 + $0x114] sm:$0xf0] }
  0x19   :  { %v2003_v19 = vor.u32 %v2550_v17, %v2000_v18  ;;  %505 = vmatpush.bf16.msra.mxu1 %v1995_v15  ;;  %v2535_v22 = vld [vmem:[#allocation5 + $0xe4] sm:$0xf]  ;;  %v1935_v24 = vor.u32 %v2542_v21, %v1934_v20  ;;  %v1936_v25 = vld [vmem:[#allocation5 + $0x118] sm:$0xf0]  ;;  %v1942_v26 = vld [vmem:[#allocation5 + $0xe8] sm:$0xf] }
  0x1a   :  { %518 = vmatpush.bf16.msra.mxu2 %v1999_v16  ;;  %v2543_v27 = vld [vmem:[#allocation5 + $0x11c] sm:$0xf0]  ;;  %v1939_v28 = vor.u32 %v2535_v22, %v1936_v25  ;;  %v2536_v30 = vld [vmem:[#allocation5 + $0xec] sm:$0xf]  ;;  %v1944_v31 = vld [vmem:[#allocation5 + $0x120] sm:$0xf0] }
  0x1b   :  { %v2687_v5 = vpop.eup %2686  ;;  %531 = vmatpush.bf16.msra.mxu3 %v2003_v19  ;;  %v1943_v29 = vor.u32 %v2543_v27, %v1942_v26  ;;  %v1947_v32 = vor.u32 %v2536_v30, %v1944_v31  ;;  %v1878_v33 = vld [vmem:[#allocation5 + $0x70] sm:$0xf]  ;;  %v2528_v34 = vld [vmem:[#allocation5 + $0xa4] sm:$0xf0]  ;;  %v2521_v35 = vld [vmem:[#allocation5 + $0x74] sm:$0xf] }
  0x1c   :  { %v87_v6 = vmul.f32 64.0, %v2687_v5  ;;  %493 = vmatpush.bf16.msra.mxu0 %v1935_v24  ;;  %v1879_v37 = vor.u32 %v2528_v34, %v1878_v33  ;;  %v1880_v38 = vld [vmem:[#allocation5 + $0xa8] sm:$0xf0]  ;;  %v1886_v39 = vld [vmem:[#allocation5 + $0x78] sm:$0xf]  ;;  %vm91_vm1 = vweird.f32 %v2687_v5 }
  0x1d   :  { %506 = vmatpush.bf16.msra.mxu1 %v1939_v28  ;;  %v2529_v40 = vld [vmem:[#allocation5 + $0xac] sm:$0xf0]  ;;  %v1883_v41 = vor.u32 %v2521_v35, %v1880_v38  ;;  %v2522_v43 = vld [vmem:[#allocation5 + $0x7c] sm:$0xf]  ;;  %v1888_v44 = vld [vmem:[#allocation5 + $0xb0] sm:$0xf0] }
  0x1e   :  { %96 = vadd.xlane.f32.xlu0 %v95_v3  ;;  %v88_v7 = vsub.f32 1.0, %v87_v6  ;;  %519 = vmatpush.bf16.msra.mxu2 %v1943_v29  ;;  %v1887_v42 = vor.u32 %v2529_v40, %v1886_v39  ;;  %v1891_v46 = vor.u32 %v2522_v43, %v1888_v44  ;;  %v1822_v47 = vld [vmem:[#allocation5] sm:$0xf]  ;;  %v2514_v48 = vld [vmem:[#allocation5 + $0x34] sm:$0xf0] }
  0x1f   :  { %532 = vmatpush.bf16.msra.mxu3 %v1947_v32  ;;  %v2507_v49 = vld [vmem:[#allocation5 + $0x4] sm:$0xf]  ;;  %v1823_v51 = vor.u32 %v2514_v48, %v1822_v47  ;;  %v1824_v52 = vld [vmem:[#allocation5 + $0x38] sm:$0xf0]  ;;  %v1830_v53 = vld [vmem:[#allocation5 + $0x8] sm:$0xf] }
  0x20   :  { %v89_v23 = vmul.f32 %v2687_v5, %v88_v7  ;;  %494 = vmatpush.bf16.msra.mxu0 %v1879_v37  ;;  %v2515_v54 = vld [vmem:[#allocation5 + $0x3c] sm:$0xf0]  ;;  %v1827_v55 = vor.u32 %v2507_v49, %v1824_v52  ;;  %v2508_v57 = vld [vmem:[#allocation5 + $0xc] sm:$0xf]  ;;  %v1832_v58 = vld [vmem:[#allocation5 + $0x40] sm:$0xf0] }
  0x21   :  { %507 = vmatpush.bf16.msra.mxu1 %v1883_v41  ;;  %v1831_v56 = vor.u32 %v2515_v54, %v1830_v53  ;;  %v1835_v59 = vor.u32 %v2508_v57, %v1832_v58  ;;  %v2006_v61 = vld [vmem:[#allocation5 + $0x160] sm:$0xf]  ;;  %v2558_v62 = vld [vmem:[#allocation5 + $0x194] sm:$0xf0]  ;;  %v2551_v63 = vld [vmem:[#allocation5 + $0x164] sm:$0xf] }
  0x22   :  { %v90_v36 = vadd.f32 %v2687_v5, %v89_v23  ;;  %520 = vmatpush.bf16.msra.mxu2 %v1887_v42  ;;  %v2007_v1 = vor.u32 %v2558_v62, %v2006_v61  ;;  %v2008_v2 = vld [vmem:[#allocation5 + $0x198] sm:$0xf0]  ;;  %v2014_v3 = vld [vmem:[#allocation5 + $0x168] sm:$0xf]  ;;  %v2559_v4 = vld [vmem:[#allocation5 + $0x19c] sm:$0xf0] }
  0x23   :  { %533 = vmatpush.bf16.msra.mxu3 %v1891_v46  ;;  %v2011_v6 = vor.u32 %v2551_v63, %v2008_v2  ;;  %v2015_v7 = vor.u32 %v2559_v4, %v2014_v3  ;;  %v2552_v8 = vld [vmem:[#allocation5 + $0x16c] sm:$0xf]  ;;  %v2016_v9 = vld [vmem:[#allocation5 + $0x1a0] sm:$0xf0]  ;;  %v1950_v10 = vld [vmem:[#allocation5 + $0xf0] sm:$0xf] }
  0x24   :  { %v92_v50 = vsel %vm91_vm1, %v2687_v5, %v90_v36  ;;  %495 = vmatpush.bf16.msra.mxu0 %v1823_v51  ;;  %v2019_v13 = vor.u32 %v2552_v8, %v2016_v9  ;;  %v2544_v14 = vld [vmem:[#allocation5 + $0x124] sm:$0xf0]  ;;  %v2537_v15 = vld [vmem:[#allocation5 + $0xf4] sm:$0xf]  ;;  %v1952_v16 = vld [vmem:[#allocation5 + $0x128] sm:$0xf0] }
  0x25   :  { %508 = vmatpush.bf16.msra.mxu1 %v1827_v55  ;;  %v1951_v17 = vor.u32 %v2544_v14, %v1950_v10  ;;  %v1955_v18 = vor.u32 %v2537_v15, %v1952_v16  ;;  %v1958_v19 = vld [vmem:[#allocation5 + $0xf8] sm:$0xf]  ;;  %v2545_v20 = vld [vmem:[#allocation5 + $0x12c] sm:$0xf0]  ;;  %v2538_v21 = vld [vmem:[#allocation5 + $0xfc] sm:$0xf] }
  0x26   :  { %521 = vmatpush.bf16.msra.mxu2 %v1831_v56  ;;  %v1959_v23 = vor.u32 %v2545_v20, %v1958_v19  ;;  %v1960_v24 = vld [vmem:[#allocation5 + $0x130] sm:$0xf0]  ;;  %v1894_v25 = vld [vmem:[#allocation5 + $0x80] sm:$0xf]  ;;  %v2530_v26 = vld [vmem:[#allocation5 + $0xb4] sm:$0xf0] }
  0x27   :  { %534 = vmatpush.bf16.msra.mxu3 %v1835_v59  ;;  %v1963_v27 = vor.u32 %v2538_v21, %v1960_v24  ;;  %v2523_v28 = vld [vmem:[#allocation5 + $0x84] sm:$0xf]  ;;  %v1896_v29 = vld [vmem:[#allocation5 + $0xb8] sm:$0xf0]  ;;  %v1902_v30 = vld [vmem:[#allocation5 + $0x88] sm:$0xf]  ;;  %v1895_v32 = vor.u32 %v2530_v26, %v1894_v25 }
  0x28   :  { %544 = vmatpush.bf16.msrb.mxu0 %v2007_v1  ;;  %v2531_v33 = vld [vmem:[#allocation5 + $0xbc] sm:$0xf0]  ;;  %v2524_v34 = vld [vmem:[#allocation5 + $0x8c] sm:$0xf]  ;;  %v1899_v35 = vor.u32 %v2523_v28, %v1896_v29  ;;  %v1904_v37 = vld [vmem:[#allocation5 + $0xc0] sm:$0xf0] }
  0x29   :  { %557 = vmatpush.bf16.msrb.mxu1 %v2011_v6  ;;  %v1903_v36 = vor.u32 %v2531_v33, %v1902_v30  ;;  %v1838_v38 = vld [vmem:[#allocation5 + $0x10] sm:$0xf]  ;;  %v2516_v39 = vld [vmem:[#allocation5 + $0x44] sm:$0xf0]  ;;  %v1907_v41 = vor.u32 %v2524_v34, %v1904_v37  ;;  %v2509_v42 = vld [vmem:[#allocation5 + $0x14] sm:$0xf] }
  0x2a   :  { %570 = vmatpush.bf16.msrb.mxu2 %v2015_v7  ;;  %v1840_v43 = vld [vmem:[#allocation5 + $0x48] sm:$0xf0]  ;;  %v1846_v44 = vld [vmem:[#allocation5 + $0x18] sm:$0xf]  ;;  %v2510_v46 = vld [vmem:[#allocation5 + $0x1c] sm:$0xf]  ;;  %v1839_v47 = vor.u32 %v2516_v39, %v1838_v38 }
  0x2b   :  { %583 = vmatpush.bf16.msrb.mxu3 %v2019_v13  ;;  %v1848_v48 = vld [vmem:[#allocation5 + $0x50] sm:$0xf0]  ;;  %v1843_v49 = vor.u32 %v2509_v42, %v1840_v43  ;;  %v2022_v59 = vld [vmem:[#allocation5 + $0x170] sm:$0xf]  ;;  %v2560_v61 = vld [vmem:[#allocation5 + $0x1a4] sm:$0xf0] }
  0x2c   :  { %545 = vmatpush.bf16.msrb.mxu0 %v1951_v17  ;;  %v1851_v51 = vor.u32 %v2510_v46, %v1848_v48  ;;  %v2553_v63 = vld [vmem:[#allocation5 + $0x174] sm:$0xf]  ;;  %v2024_v1 = vld [vmem:[#allocation5 + $0x1a8] sm:$0xf0]  ;;  %v2030_v2 = vld [vmem:[#allocation5 + $0x178] sm:$0xf]  ;;  %v2023_v8 = vor.u32 %v2560_v61, %v2022_v59 }
  0x2d   :  { %558 = vmatpush.bf16.msrb.mxu1 %v1955_v18  ;;  %v2561_v4 = vld [vmem:[#allocation5 + $0x1ac] sm:$0xf0]  ;;  %v2032_v6 = vld [vmem:[#allocation5 + $0x1b0] sm:$0xf0]  ;;  %v2027_v9 = vor.u32 %v2553_v63, %v2024_v1  ;;  %v1966_v10 = vld [vmem:[#allocation5 + $0x100] sm:$0xf] }
  0x2e   :  { %571 = vmatpush.bf16.msrb.mxu2 %v1959_v23  ;;  %v1968_v13 = vld [vmem:[#allocation5 + $0x138] sm:$0xf0]  ;;  %v1974_v14 = vld [vmem:[#allocation5 + $0x108] sm:$0xf]  ;;  %v2547_v15 = vld [vmem:[#allocation5 + $0x13c] sm:$0xf0] }
  0x2f   :  { %584 = vmatpush.bf16.msrb.mxu3 %v1963_v27  ;;  %v2540_v16 = vld [vmem:[#allocation5 + $0x10c] sm:$0xf]  ;;  %v1976_v17 = vld [vmem:[#allocation5 + $0x140] sm:$0xf0]  ;;  %v1910_v20 = vld [vmem:[#allocation5 + $0x90] sm:$0xf] }
  0x30   :  { %546 = vmatpush.bf16.msrb.mxu0 %v1895_v32  ;;  %v2532_v21 = vld [vmem:[#allocation5 + $0xc4] sm:$0xf0]  ;;  %v1979_v23 = vor.u32 %v2540_v16, %v1976_v17  ;;  %v2525_v24 = vld [vmem:[#allocation5 + $0x94] sm:$0xf]  ;;  %v1912_v25 = vld [vmem:[#allocation5 + $0xc8] sm:$0xf0] }
  0x31   :  { %559 = vmatpush.bf16.msrb.mxu1 %v1899_v35  ;;  %v1918_v26 = vld [vmem:[#allocation5 + $0x98] sm:$0xf]  ;;  %v2533_v27 = vld [vmem:[#allocation5 + $0xcc] sm:$0xf0]  ;;  %v2526_v28 = vld [vmem:[#allocation5 + $0x9c] sm:$0xf]  ;;  %v1911_v30 = vor.u32 %v2532_v21, %v1910_v20 }
  0x32   :  { %572 = vmatpush.bf16.msrb.mxu2 %v1903_v36  ;;  %v1920_v29 = vld [vmem:[#allocation5 + $0xd0] sm:$0xf0]  ;;  %v1854_v32 = vld [vmem:[#allocation5 + $0x20] sm:$0xf]  ;;  %v2518_v33 = vld [vmem:[#allocation5 + $0x54] sm:$0xf0]  ;;  %v1919_v34 = vor.u32 %v2533_v27, %v1918_v26 }
  0x33   :  { %585 = vmatpush.bf16.msrb.mxu3 %v1907_v41  ;;  %v1923_v35 = vor.u32 %v2526_v28, %v1920_v29  ;;  %v2511_v36 = vld [vmem:[#allocation5 + $0x24] sm:$0xf]  ;;  %v1856_v37 = vld [vmem:[#allocation5 + $0x58] sm:$0xf0]  ;;  %v1862_v38 = vld [vmem:[#allocation5 + $0x28] sm:$0xf]  ;;  %v1855_v42 = vor.u32 %v2518_v33, %v1854_v32 }
  0x34   :  { %547 = vmatpush.bf16.msrb.mxu0 %v1839_v47  ;;  %v2519_v39 = vld [vmem:[#allocation5 + $0x5c] sm:$0xf0]  ;;  %v1864_v41 = vld [vmem:[#allocation5 + $0x60] sm:$0xf0]  ;;  %v1859_v43 = vor.u32 %v2511_v36, %v1856_v37  ;;  %v2562_v47 = vld [vmem:[#allocation5 + $0x1b4] sm:$0xf0] }
  0x35   :  { %560 = vmatpush.bf16.msrb.mxu1 %v1843_v49  ;;  %v2555_v48 = vld [vmem:[#allocation5 + $0x184] sm:$0xf]  ;;  %v2040_v49 = vld [vmem:[#allocation5 + $0x1b8] sm:$0xf0]  ;;  %v1926_v61 = vld [vmem:[#allocation5 + $0xa0] sm:$0xf] }
  0x36   :  { %v2527_v63 = vld [vmem:[#allocation5 + $0xa4] sm:$0xf]  ;;  %v1928_v1 = vld [vmem:[#allocation5 + $0xd8] sm:$0xf0]  ;;  %v2583_v27 = vld [vmem:[#allocation8 + $0xa0] sm:$0xff] }
  0x37   :  { %586 = vmatpush.bf16.msrb.mxu3 %v1851_v51  ;;  %v2043_v51 = vor.u32 %v2555_v48, %v2040_v49  ;;  %v2594_v16 = vld [vmem:[#allocation8 + $0xf8] sm:$0xff]  ;;  %v2593_v20 = vld [vmem:[#allocation8 + $0xf0] sm:$0xff]  ;;  %v2572_v26 = vld [vmem:[#allocation8 + $0x48] sm:$0xff] }
  0x38   :  { %v2566_v17 = vld [vmem:[#allocation8 + $0x18] sm:$0xff]  ;;  %v2565_v21 = vld [vmem:[#allocation8 + $0x10] sm:$0xff]  ;;  %v2591_v28 = vld [vmem:[#allocation8 + $0xe0] sm:$0xff] }
  0x39   :  { %v2563_v29 = vld [vmem:[#allocation8] sm:$0xff]  ;;  %v2610_v32 = vld [vmem:[#allocation8 + $0x178] sm:$0xff]  ;;  %v2609_v36 = vld [vmem:[#allocation8 + $0x170] sm:$0xff] }
  0x3a   :  { %v2582_v33 = vld [vmem:[#allocation8 + $0x98] sm:$0xff]  ;;  %v2581_v37 = vld [vmem:[#allocation8 + $0x90] sm:$0xff] }
  0x3b   :  { %v2598_v48 = vld [vmem:[#allocation8 + $0x118] sm:$0xff] }
  0x3c   :  { %v2606_v49 = vld [vmem:[#allocation8 + $0x158] sm:$0xff] }
  0x89   :  { %v85_v45 = vpop.xlane.xlu0 %84 }
  0x8a   :  { %v2907_v60 = vmul.f32 %v92_v50, %v85_v45  ;;  %v2517_v45 = vld [vmem:[#allocation5 + $0x4c] sm:$0xf0] }
  0x8c   :  { %v99_v11 = vmul.f32 %v2907_v60, %v2907_v60  ;;  %v102_v58 = vsub.f32 %v2902_v0, %v2907_v60  ;;  %v2539_v60 = vld [vmem:[#allocation5 + $0x104] sm:$0xf] }
  0x8d   :  { %v1971_v19 = vor.u32 %v2539_v60, %v1968_v13  ;;  %v2567_v13 = vld [vmem:[#allocation8 + $0x20] sm:$0xff] }
  0x91   :  { %v97_v5 = vpop.xlane.xlu0 %96 }
  0x92   :  { %v98_v12 = vmul.f32 %v97_v5, %v92_v50  ;;  %v1847_v50 = vor.u32 %v2517_v45, %v1846_v44  ;;  %v2554_v5 = vld [vmem:[#allocation5 + $0x17c] sm:$0xf]  ;;  %v2038_v44 = vld [vmem:[#allocation5 + $0x180] sm:$0xf]  ;;  %v1863_v45 = vor.u32 %v2519_v39, %v1862_v38 }
  0x93   :  { %v2035_v0 = vor.u32 %v2554_v5, %v2032_v6  ;;  %v1931_v5 = vor.u32 %v2527_v63, %v1928_v1  ;;  %v1870_v6 = vld [vmem:[#allocation5 + $0x30] sm:$0xf]  ;;  %v2589_v38 = vld [vmem:[#allocation8 + $0xd0] sm:$0xff]  ;;  %v2600_v39 = vld [vmem:[#allocation8 + $0x128] sm:$0xff] }
  0x94   :  { %v100_v22 = vsub.f32 %v98_v12, %v99_v11  ;;  %573 = vmatpush.bf16.msrb.mxu2 %v1847_v50  ;;  %v2546_v11 = vld [vmem:[#allocation5 + $0x134] sm:$0xf0]  ;;  %v2031_v12 = vor.u32 %v2561_v4, %v2030_v2  ;;  %v2039_v50 = vor.u32 %v2562_v47, %v2038_v44  ;;  %v2569_v2 = vld [vmem:[#allocation8 + $0x30] sm:$0xff]  ;;  %v2579_v44 = vld [vmem:[#allocation8 + $0x80] sm:$0xff] }
  0x95   :  { %v1967_v18 = vor.u32 %v2546_v11, %v1966_v10  ;;  %v1872_v10 = vld [vmem:[#allocation5 + $0x68] sm:$0xf0]  ;;  %v2568_v11 = vld [vmem:[#allocation8 + $0x28] sm:$0xff]  ;;  %v2613_v63 = vld [vmem:[#allocation8 + $0x190] sm:$0xff] }
  0x96   :  { %v101_v31 = vmax.f32 %v100_v22, 0.0  ;;  %v1975_v22 = vor.u32 %v2547_v15, %v1974_v14  ;;  %v2575_v14 = vld [vmem:[#allocation8 + $0x60] sm:$0xff]  ;;  %v2586_v15 = vld [vmem:[#allocation8 + $0xb8] sm:$0xff]  ;;  %v2621_v1 = vld [vmem:[#allocation8 + $0x1d0] sm:$0xff] }
  0x97   :  { %v2626_v47 = vld [vmem:[#allocation8 + $0x1f8] sm:$0xff] }
  0x98   :  { %v103_v40 = vadd.f32 1e-05, %v101_v31  ;;  %v1915_v31 = vor.u32 %v2525_v24, %v1912_v25  ;;  %v2592_v24 = vld [vmem:[#allocation8 + $0xe8] sm:$0xff] }
  0x99   :  { %v2564_v25 = vld [vmem:[#allocation8 + $0x8] sm:$0xff] }
  0x9a   :  { %2688 = vrsqrt.f32 %v103_v40  ;;  %vm110_vm3 = vweird.f32 %v103_v40 }
  0xa0   :  { %v2689_v52 = vpop.eup %2688 }
  0xa1   :  { %v105_v53 = vmul.f32 %v2689_v52, %v103_v40  ;;  %vm111_vm2 = vweird.f32 %v2689_v52  ;;  %v2512_v40 = vld [vmem:[#allocation5 + $0x2c] sm:$0xf] }
  0xa2   :  { %vm112_vm4 = vmor %vm110_vm3, %vm111_vm2  ;;  %v1867_v46 = vor.u32 %v2512_v40, %v1864_v41  ;;  %v2608_v40 = vld [vmem:[#allocation8 + $0x168] sm:$0xff] }
  0xa3   :  { %v106_v54 = vmul.f32 %v2689_v52, %v105_v53  ;;  %v2548_v53 = vld [vmem:[#allocation5 + $0x144] sm:$0xf0]  ;;  %v2580_v41 = vld [vmem:[#allocation8 + $0x88] sm:$0xff] }
  0xa5   :  { %v107_v55 = vmul.f32 0.5, %v106_v54  ;;  %v2541_v54 = vld [vmem:[#allocation5 + $0x114] sm:$0xf] }
  0xa7   :  { %v108_v56 = vsub.f32 1.5, %v107_v55  ;;  %v1984_v55 = vld [vmem:[#allocation5 + $0x148] sm:$0xf0] }
  0xa8   :  { %v1987_v59 = vor.u32 %v2541_v54, %v1984_v55  ;;  %v2615_v54 = vld [vmem:[#allocation8 + $0x1a0] sm:$0xff] }
  0xa9   :  { %v109_v57 = vmul.f32 %v2689_v52, %v108_v56  ;;  %v2570_v56 = vld [vmem:[#allocation8 + $0x38] sm:$0xff]  ;;  %v2623_v55 = vld [vmem:[#allocation8 + $0x1e0] sm:$0xff] }
  0xab   :  { %v113_v62 = vsel %vm112_vm4, %v2689_v52, %v109_v57  ;;  %v1982_v52 = vld [vmem:[#allocation5 + $0x110] sm:$0xf]  ;;  %v2578_v57 = vld [vmem:[#allocation8 + $0x78] sm:$0xff] }
  0xac   :  { %v114_v3 = vmul.f32 %v113_v62, %v102_v58  ;;  %v1983_v58 = vor.u32 %v2548_v53, %v1982_v52  ;;  %v2534_v62 = vld [vmem:[#allocation5 + $0xd4] sm:$0xf0] }
  0xad   :  { %v1927_v4 = vor.u32 %v2534_v62, %v1926_v61  ;;  %v2616_v52 = vld [vmem:[#allocation8 + $0x1a8] sm:$0xff] }
  0xae   :  { %v2913_v7 = vpack.c.bf16 %v114_v3, %v114_v3  ;;  %v2577_v3 = vld [vmem:[#allocation8 + $0x70] sm:$0xff]  ;;  %v2624_v53 = vld [vmem:[#allocation8 + $0x1e8] sm:$0xff] }
  0xaf   :  { %v2596_v61 = vld [vmem:[#allocation8 + $0x108] sm:$0xff] }
  0xb0   :  { %2044 = vmatmul.msk.bf16.vlgmr.msra.gmra.mxu0 %vm484_vm5, %v2913_v7  ;;  %2045 = vmatmul.msk.bf16.vlgmr.msra.gmra.mxu1 %vm484_vm5, %v2913_v7  ;;  %v2604_v62 = vld [vmem:[#allocation8 + $0x148] sm:$0xff] }
  0xb1   :  { %2046 = vmatmul.msk.bf16.vlgmr.msra.gmra.mxu2 %vm484_vm5, %v2913_v7  ;;  %2047 = vmatmul.msk.bf16.vlgmr.msra.gmra.mxu3 %vm484_vm5, %v2913_v7 }
  0xb2   :  { %596 = vmatpush.bf16.msra.mxu0 %v2023_v8  ;;  %609 = vmatpush.bf16.msra.mxu1 %v2027_v9  ;;  %v2520_v8 = vld [vmem:[#allocation5 + $0x64] sm:$0xf0]  ;;  %v2513_v9 = vld [vmem:[#allocation5 + $0x34] sm:$0xf] }
  0xb3   :  { %622 = vmatpush.bf16.msra.mxu2 %v2031_v12  ;;  %635 = vmatpush.bf16.msra.mxu3 %v2035_v0  ;;  %v2576_v12 = vld [vmem:[#allocation8 + $0x68] sm:$0xff]  ;;  %v1871_v0 = vor.u32 %v2520_v8, %v1870_v6  ;;  %v1875_v60 = vor.u32 %v2513_v9, %v1872_v10  ;;  %v2611_v6 = vld [vmem:[#allocation8 + $0x180] sm:$0xff]  ;;  %v2943_v9 = vld [vmem:[#allocation7] sm:$0xff] }
  0xb4   :  { %v2619_v8 = vld [vmem:[#allocation8 + $0x1c0] sm:$0xff]  ;;  %v176_v10 = vperm.slane %v2943_v9, 0 }
  0xb6   :  { %597 = vmatpush.bf16.msra.mxu0 %v1967_v18  ;;  %610 = vmatpush.bf16.msra.mxu1 %v1971_v19  ;;  %v2574_v18 = vld [vmem:[#allocation8 + $0x58] sm:$0xff]  ;;  %v2585_v19 = vld [vmem:[#allocation8 + $0xb0] sm:$0xff] }
  0xb7   :  { %623 = vmatpush.bf16.msra.mxu2 %v1975_v22  ;;  %636 = vmatpush.bf16.msra.mxu3 %v1979_v23  ;;  %v2573_v22 = vld [vmem:[#allocation8 + $0x50] sm:$0xff]  ;;  %v2584_v23 = vld [vmem:[#allocation8 + $0xa8] sm:$0xff] }
  0xba   :  { %598 = vmatpush.bf16.msra.mxu0 %v1911_v30  ;;  %611 = vmatpush.bf16.msra.mxu1 %v1915_v31  ;;  %v2571_v30 = vld [vmem:[#allocation8 + $0x40] sm:$0xff]  ;;  %v2602_v31 = vld [vmem:[#allocation8 + $0x138] sm:$0xff] }
  0xbb   :  { %624 = vmatpush.bf16.msra.mxu2 %v1919_v34  ;;  %637 = vmatpush.bf16.msra.mxu3 %v1923_v35  ;;  %v2590_v34 = vld [vmem:[#allocation8 + $0xd8] sm:$0xff]  ;;  %v2601_v35 = vld [vmem:[#allocation8 + $0x130] sm:$0xff] }
  0xbe   :  { %599 = vmatpush.bf16.msra.mxu0 %v1855_v42  ;;  %612 = vmatpush.bf16.msra.mxu1 %v1859_v43  ;;  %v2588_v42 = vld [vmem:[#allocation8 + $0xc8] sm:$0xff]  ;;  %v2599_v43 = vld [vmem:[#allocation8 + $0x120] sm:$0xff] }
  0xbf   :  { %625 = vmatpush.bf16.msra.mxu2 %v1863_v45  ;;  %638 = vmatpush.bf16.msra.mxu3 %v1867_v46  ;;  %v2587_v45 = vld [vmem:[#allocation8 + $0xc0] sm:$0xff]  ;;  %v2618_v46 = vld [vmem:[#allocation8 + $0x1b8] sm:$0xff] }
  0xc0   :  { %2048 = vmatmul.msk.bf16.vlgmr.msrb.gmra.mxu0 %vm484_vm5, %v2913_v7  ;;  %2049 = vmatmul.msk.bf16.vlgmr.msrb.gmra.mxu1 %vm484_vm5, %v2913_v7 }
  0xc1   :  { %2050 = vmatmul.msk.bf16.vlgmr.msrb.gmra.mxu2 %vm484_vm5, %v2913_v7  ;;  %2051 = vmatmul.msk.bf16.vlgmr.msrb.gmra.mxu3 %vm484_vm5, %v2913_v7 }
  0xc2   :  { %648 = vmatpush.bf16.msrb.mxu0 %v2039_v50  ;;  %661 = vmatpush.bf16.msrb.mxu1 %v2043_v51  ;;  %v2617_v50 = vld [vmem:[#allocation8 + $0x1b0] sm:$0xff] }
  0xc3   :  { %1598 = vmatpush.bf16.msrb.mxu2 %v2570_v56  ;;  %1611 = vmatpush.bf16.msrb.mxu3 %v2578_v57  ;;  %v2625_v51 = vld [vmem:[#allocation8 + $0x1f0] sm:$0xff] }
  0xc4   :  { %v2597_v56 = vld [vmem:[#allocation8 + $0x110] sm:$0xff] }
  0xc5   :  { %v2605_v57 = vld [vmem:[#allocation8 + $0x150] sm:$0xff] }
  0xc6   :  { %649 = vmatpush.bf16.msrb.mxu0 %v1983_v58  ;;  %662 = vmatpush.bf16.msrb.mxu1 %v1987_v59  ;;  %v2614_v58 = vld [vmem:[#allocation8 + $0x198] sm:$0xff] }
  0xc7   :  { %1599 = vmatpush.bf16.msrb.mxu2 %v2569_v2  ;;  %1612 = vmatpush.bf16.msrb.mxu3 %v2577_v3  ;;  %v2622_v59 = vld [vmem:[#allocation8 + $0x1d8] sm:$0xff]  ;;  %v2595_v2 = vld [vmem:[#allocation8 + $0x100] sm:$0xff] }
  0xc8   :  { %v2603_v3 = vld [vmem:[#allocation8 + $0x140] sm:$0xff] }
  0xca   :  { %650 = vmatpush.bf16.msrb.mxu0 %v1927_v4  ;;  %663 = vmatpush.bf16.msrb.mxu1 %v1931_v5  ;;  %v2612_v4 = vld [vmem:[#allocation8 + $0x188] sm:$0xff] }
  0xcb   :  { %1600 = vmatpush.bf16.msrb.mxu2 %v2568_v11  ;;  %1613 = vmatpush.bf16.msrb.mxu3 %v2576_v12  ;;  %v2620_v5 = vld [vmem:[#allocation8 + $0x1c8] sm:$0xff]  ;;  %v177_v11 = vperm.slane %v2943_v9, 1 }
  0xce   :  { %651 = vmatpush.bf16.msrb.mxu0 %v1871_v0  ;;  %664 = vmatpush.bf16.msrb.mxu1 %v1875_v60 }
  0xcf   :  { %1601 = vmatpush.bf16.msrb.mxu2 %v2567_v13  ;;  %1614 = vmatpush.bf16.msrb.mxu3 %v2575_v14  ;;  %v178_v14 = vperm.slane %v2943_v9, 2 }
  0xd0   :  { %2052 = vmatmul.msk.bf16.vlgmr.msra.gmra.mxu0 %vm484_vm5, %v2913_v7  ;;  %2053 = vmatmul.msk.bf16.vlgmr.msra.gmra.mxu1 %vm484_vm5, %v2913_v7 }
  0xd1   :  { %2054 = vmatmul.msk.bf16.vlgmr.msra.gmra.mxu2 %vm484_vm5, %v2913_v7  ;;  %2055 = vmatmul.msk.bf16.vlgmr.msra.gmra.mxu3 %vm484_vm5, %v2913_v7 }
  0xd2   :  { %1624 = vmatpush.bf16.msra.mxu0 %v2586_v15  ;;  %1637 = vmatpush.bf16.msra.mxu1 %v2594_v16  ;;  %v179_v15 = vperm.slane %v2943_v9, 3 }
  0xd3   :  { %1602 = vmatpush.bf16.msrb.mxu2 %v2566_v17  ;;  %1615 = vmatpush.bf16.msrb.mxu3 %v2574_v18 }
  0xd6   :  { %1625 = vmatpush.bf16.msra.mxu0 %v2585_v19  ;;  %1638 = vmatpush.bf16.msra.mxu1 %v2593_v20 }
  0xd7   :  { %1603 = vmatpush.bf16.msrb.mxu2 %v2565_v21  ;;  %1616 = vmatpush.bf16.msrb.mxu3 %v2573_v22 }
  0xda   :  { %1626 = vmatpush.bf16.msra.mxu0 %v2584_v23  ;;  %1639 = vmatpush.bf16.msra.mxu1 %v2592_v24  ;;  %v2634_v23 = vld [vmem:[#allocation8 + $0x238] sm:$0xff] }
  0xdb   :  { %1604 = vmatpush.bf16.msrb.mxu2 %v2564_v25  ;;  %1617 = vmatpush.bf16.msrb.mxu3 %v2572_v26  ;;  %v2642_v26 = vld [vmem:[#allocation8 + $0x278] sm:$0xff] }
  0xde   :  { %1627 = vmatpush.bf16.msra.mxu0 %v2583_v27  ;;  %1640 = vmatpush.bf16.msra.mxu1 %v2591_v28  ;;  %v180_v28 = vperm.slane %v2943_v9, 4 }
  0xdf   :  { %1605 = vmatpush.bf16.msrb.mxu2 %v2563_v29  ;;  %1618 = vmatpush.bf16.msrb.mxu3 %v2571_v30  ;;  %v181_v29 = vperm.slane %v2943_v9, 5  ;;  %v2633_v30 = vld [vmem:[#allocation8 + $0x230] sm:$0xff] }
  0xe0   :  { %2056 = vmatmul.msk.bf16.vlgmr.msrb.gmra.mxu0 %vm484_vm5, %v2913_v7  ;;  %2057 = vmatmul.msk.bf16.vlgmr.msrb.gmra.mxu1 %vm484_vm5, %v2913_v7  ;;  %v2607_v7 = vld [vmem:[#allocation8 + $0x160] sm:$0xff] }
  0xe2   :  { %1628 = vmatpush.bf16.msra.mxu0 %v2582_v33  ;;  %1641 = vmatpush.bf16.msra.mxu1 %v2590_v34 }
  0xe3   :  { %1650 = vmatpush.bf16.msra.mxu2 %v2602_v31  ;;  %1663 = vmatpush.bf16.msra.mxu3 %v2610_v32  ;;  %v2641_v31 = vld [vmem:[#allocation8 + $0x270] sm:$0xff] }
  0xe6   :  { %1629 = vmatpush.bf16.msra.mxu0 %v2581_v37  ;;  %1642 = vmatpush.bf16.msra.mxu1 %v2589_v38  ;;  %v2650_v37 = vld [vmem:[#allocation8 + $0x2b8] sm:$0xff] }
  0xe7   :  { %1651 = vmatpush.bf16.msra.mxu2 %v2601_v35  ;;  %1664 = vmatpush.bf16.msra.mxu3 %v2609_v36 }
  0xea   :  { %1630 = vmatpush.bf16.msra.mxu0 %v2580_v41  ;;  %1643 = vmatpush.bf16.msra.mxu1 %v2588_v42  ;;  %v2658_v42 = vld [vmem:[#allocation8 + $0x2f8] sm:$0xff] }
  0xeb   :  { %1652 = vmatpush.bf16.msra.mxu2 %v2600_v39  ;;  %1665 = vmatpush.bf16.msra.mxu3 %v2608_v40 }
  0xee   :  { %1631 = vmatpush.bf16.msra.mxu0 %v2579_v44  ;;  %1644 = vmatpush.bf16.msra.mxu1 %v2587_v45  ;;  %v2640_v44 = vld [vmem:[#allocation8 + $0x268] sm:$0xff]  ;;  %v182_v45 = vperm.slane %v2943_v9, 6 }
  0xef   :  { %1653 = vmatpush.bf16.msra.mxu2 %v2599_v43  ;;  %1666 = vmatpush.bf16.msra.mxu3 %v2607_v7  ;;  %v2632_v43 = vld [vmem:[#allocation8 + $0x228] sm:$0xff] }
  0xf2   :  { %1676 = vmatpush.bf16.msrb.mxu0 %v2618_v46  ;;  %1689 = vmatpush.bf16.msrb.mxu1 %v2626_v47  ;;  %v183_v46 = vperm.slane %v2943_v9, 7  ;;  %v2649_v47 = vld [vmem:[#allocation8 + $0x2b0] sm:$0xff] }
  0xf3   :  { %1654 = vmatpush.bf16.msra.mxu2 %v2598_v48  ;;  %1667 = vmatpush.bf16.msra.mxu3 %v2606_v49  ;;  %v2657_v48 = vld [vmem:[#allocation8 + $0x2f0] sm:$0xff]  ;;  %v2631_v49 = vld [vmem:[#allocation8 + $0x220] sm:$0xff] }
  0xf4   :  { %v2629_v9 = vld [vmem:[#allocation8 + $0x210] sm:$0xff] }
  0xf6   :  { %1677 = vmatpush.bf16.msrb.mxu0 %v2617_v50  ;;  %1690 = vmatpush.bf16.msrb.mxu1 %v2625_v51  ;;  %v2639_v50 = vld [vmem:[#allocation8 + $0x260] sm:$0xff] }
  0xf7   :  { %1655 = vmatpush.bf16.msra.mxu2 %v2597_v56  ;;  %1668 = vmatpush.bf16.msra.mxu3 %v2605_v57  ;;  %v2648_v57 = vld [vmem:[#allocation8 + $0x2a8] sm:$0xff] }
  0xfa   :  { %1678 = vmatpush.bf16.msrb.mxu0 %v2616_v52  ;;  %1691 = vmatpush.bf16.msrb.mxu1 %v2624_v53 }
  0xfb   :  { %1656 = vmatpush.bf16.msra.mxu2 %v2596_v61  ;;  %1669 = vmatpush.bf16.msra.mxu3 %v2604_v62 }
  0xfe   :  { %1679 = vmatpush.bf16.msrb.mxu0 %v2615_v54  ;;  %1692 = vmatpush.bf16.msrb.mxu1 %v2623_v55 }
  0xff   :  { %1657 = vmatpush.bf16.msra.mxu2 %v2595_v2  ;;  %1670 = vmatpush.bf16.msra.mxu3 %v2603_v3  ;;  %v2953_v2 = vld [vmem:[#allocation7 + $0x8] sm:$0x3f] }
 0x102   :  { %1680 = vmatpush.bf16.msrb.mxu0 %v2614_v58  ;;  %1693 = vmatpush.bf16.msrb.mxu1 %v2622_v59  ;;  %v2656_v59 = vld [vmem:[#allocation8 + $0x2e8] sm:$0xff] }
 0x106   :  { %1681 = vmatpush.bf16.msrb.mxu0 %v2613_v63  ;;  %1694 = vmatpush.bf16.msrb.mxu1 %v2621_v1  ;;  %v2630_v63 = vld [vmem:[#allocation8 + $0x218] sm:$0xff] }
 0x107   :  { %v2638_v1 = vld [vmem:[#allocation8 + $0x258] sm:$0xff] }
 0x10a   :  { %1682 = vmatpush.bf16.msrb.mxu0 %v2612_v4  ;;  %1695 = vmatpush.bf16.msrb.mxu1 %v2620_v5  ;;  %v2647_v4 = vld [vmem:[#allocation8 + $0x2a0] sm:$0xff] }
 0x10b   :  { %v2655_v5 = vld [vmem:[#allocation8 + $0x2e0] sm:$0xff] }
 0x10e   :  { %1683 = vmatpush.bf16.msrb.mxu0 %v2611_v6  ;;  %1696 = vmatpush.bf16.msrb.mxu1 %v2619_v8  ;;  %v184_v6 = vperm.slane %v2953_v2, 0  ;;  %v185_v8 = vperm.slane %v2953_v2, 1 }
 0x12d   :  { %v497_v12 = vpop.f32.mrf.mxu0  ;;  %v510_v0 = vpop.f32.mrf.mxu1 }
 0x12e   :  { %v498_v60 = vadd.f32 %v497_v12, %v176_v10  ;;  %v511_v13 = vadd.f32 %v510_v0, %v177_v11  ;;  %v2637_v10 = vld [vmem:[#allocation8 + $0x250] sm:$0xff] }
 0x130   :  { %2690 = vtanh.f32 %v498_v60 }
 0x131   :  { %2692 = vtanh.f32 %v511_v13 }
 0x134   :  { %v523_v16 = vpop.f32.mrf.mxu2  ;;  %v536_v17 = vpop.f32.mrf.mxu3 }
 0x135   :  { %v524_v18 = vadd.f32 %v523_v16, %v178_v14  ;;  %v537_v19 = vadd.f32 %v536_v17, %v179_v15  ;;  %v499_v20 = vpop.f32.mrf.mxu0  ;;  %v512_v21 = vpop.f32.mrf.mxu1  ;;  %v2646_v14 = vld [vmem:[#allocation8 + $0x298] sm:$0xff] }
 0x136   :  { %v2691_v22 = vpop.eup %2690  ;;  %v2628_v21 = vld [vmem:[#allocation8 + $0x208] sm:$0xff] }
 0x137   :  { %v2693_v24 = vpop.eup %2692  ;;  %v684_v25 = vpack.c.bf16 %v2691_v22, %v2691_v22  ;;  %2694 = vtanh.f32 %v524_v18  ;;  %v2636_v22 = vld [vmem:[#allocation8 + $0x248] sm:$0xff] }
 0x138   :  { %v685_v27 = vpack.c.bf16 %v2693_v24, %v2693_v24  ;;  %2696 = vtanh.f32 %v537_v19  ;;  %v2654_v19 = vld [vmem:[#allocation8 + $0x2d8] sm:$0xff]  ;;  %v187_v24 = vperm.slane %v2953_v2, 3 }
 0x139   :  { %1606 = vmatmul.bf16.vlgmr.msrb.gmra.mxu2 %v684_v25  ;;  %v2645_v25 = vld [vmem:[#allocation8 + $0x290] sm:$0xff] }
 0x13a   :  { %1619 = vmatmul.bf16.vlgmr.msrb.gmra.mxu3 %v685_v27  ;;  %1702 = vmatpush.bf16.msrb.mxu2 %v2634_v23  ;;  %v186_v23 = vperm.slane %v2953_v2, 2  ;;  %v2627_v27 = vld [vmem:[#allocation8 + $0x200] sm:$0xff] }
 0x13b   :  { %1715 = vmatpush.bf16.msrb.mxu3 %v2642_v26  ;;  %v2653_v26 = vld [vmem:[#allocation8 + $0x2d0] sm:$0xff] }
 0x13c   :  { %v525_v32 = vpop.f32.mrf.mxu2  ;;  %v538_v33 = vpop.f32.mrf.mxu3 }
 0x13d   :  { %v2695_v34 = vpop.eup %2694  ;;  %v549_v35 = vpop.f32.mrf.mxu0  ;;  %v2674_v32 = vld [vmem:[#allocation8 + $0x378] sm:$0xff] }
 0x13e   :  { %v562_v36 = vpop.f32.mrf.mxu1  ;;  %v2697_v38 = vpop.eup %2696  ;;  %v686_v39 = vpack.c.bf16 %v2695_v34, %v2695_v34  ;;  %v550_v40 = vadd.f32 %v549_v35, %v180_v28  ;;  %1703 = vmatpush.bf16.msrb.mxu2 %v2633_v30  ;;  %v2635_v28 = vld [vmem:[#allocation8 + $0x240] sm:$0xff] }
 0x13f   :  { %v563_v41 = vadd.f32 %v562_v36, %v181_v29  ;;  %v687_v7 = vpack.c.bf16 %v2697_v38, %v2697_v38  ;;  %1716 = vmatpush.bf16.msrb.mxu3 %v2641_v31  ;;  %v2666_v31 = vld [vmem:[#allocation8 + $0x338] sm:$0xff] }
 0x140   :  { %2698 = vtanh.f32 %v550_v40  ;;  %1632 = vmatmul.bf16.vlgmr.msra.gmra.mxu0 %v686_v39  ;;  %v2652_v39 = vld [vmem:[#allocation8 + $0x2c8] sm:$0xff] }
 0x141   :  { %2700 = vtanh.f32 %v563_v41  ;;  %1645 = vmatmul.bf16.vlgmr.msra.gmra.mxu1 %v687_v7  ;;  %1728 = vmatpush.bf16.msra.mxu0 %v2650_v37  ;;  %v2644_v37 = vld [vmem:[#allocation8 + $0x288] sm:$0xff]  ;;  %v2673_v7 = vld [vmem:[#allocation8 + $0x370] sm:$0xff] }
 0x142   :  { %1741 = vmatpush.bf16.msra.mxu1 %v2658_v42  ;;  %1704 = vmatpush.bf16.msrb.mxu2 %v2632_v43  ;;  %v2665_v43 = vld [vmem:[#allocation8 + $0x330] sm:$0xff] }
 0x143   :  { %1717 = vmatpush.bf16.msrb.mxu3 %v2640_v44  ;;  %v2643_v44 = vld [vmem:[#allocation8 + $0x280] sm:$0xff] }
 0x144   :  { %v575_v51 = vpop.f32.mrf.mxu2  ;;  %v588_v52 = vpop.f32.mrf.mxu3 }
 0x145   :  { %v576_v53 = vadd.f32 %v575_v51, %v182_v45  ;;  %v589_v54 = vadd.f32 %v588_v52, %v183_v46  ;;  %1729 = vmatpush.bf16.msra.mxu0 %v2649_v47  ;;  %v551_v55 = vpop.f32.mrf.mxu0  ;;  %v2651_v45 = vld [vmem:[#allocation8 + $0x2c0] sm:$0xff] }
 0x146   :  { %v564_v56 = vpop.f32.mrf.mxu1  ;;  %v2699_v58 = vpop.eup %2698  ;;  %1742 = vmatpush.bf16.msra.mxu1 %v2657_v48  ;;  %1705 = vmatpush.bf16.msrb.mxu2 %v2631_v49  ;;  %v2664_v48 = vld [vmem:[#allocation8 + $0x328] sm:$0xff] }
 0x147   :  { %v2701_v61 = vpop.eup %2700  ;;  %v688_v62 = vpack.c.bf16 %v2699_v58, %v2699_v58  ;;  %2702 = vtanh.f32 %v576_v53  ;;  %1718 = vmatpush.bf16.msrb.mxu3 %v2639_v50  ;;  %v2672_v49 = vld [vmem:[#allocation8 + $0x368] sm:$0xff]  ;;  %v2663_v56 = vld [vmem:[#allocation8 + $0x320] sm:$0xff]  ;;  %v188_v58 = vperm.slane %v2953_v2, 4 }
 0x148   :  { %v689_v3 = vpack.c.bf16 %v2701_v61, %v2701_v61  ;;  %2704 = vtanh.f32 %v589_v54  ;;  %v2662_v61 = vld [vmem:[#allocation8 + $0x318] sm:$0xff] }
 0x149   :  { %1730 = vmatpush.bf16.msra.mxu0 %v2648_v57  ;;  %1658 = vmatmul.bf16.vlgmr.msra.gmra.mxu2 %v688_v62  ;;  %v2671_v57 = vld [vmem:[#allocation8 + $0x360] sm:$0xff]  ;;  %v2670_v62 = vld [vmem:[#allocation8 + $0x358] sm:$0xff] }
 0x14a   :  { %1743 = vmatpush.bf16.msra.mxu1 %v2656_v59  ;;  %1671 = vmatmul.bf16.vlgmr.msra.gmra.mxu3 %v689_v3  ;;  %v189_v59 = vperm.slane %v2953_v2, 5  ;;  %v2659_v2 = vld [vmem:[#allocation8 + $0x300] sm:$0xff] }
 0x14b   :  { %1706 = vmatpush.bf16.msrb.mxu2 %v2630_v63  ;;  %1719 = vmatpush.bf16.msrb.mxu3 %v2638_v1 }
 0x14c   :  { %v577_v11 = vpop.f32.mrf.mxu2  ;;  %v590_v12 = vpop.f32.mrf.mxu3 }
 0x14d   :  { %v2703_v0 = vpop.eup %2702  ;;  %1731 = vmatpush.bf16.msra.mxu0 %v2647_v4  ;;  %v601_v60 = vpop.f32.mrf.mxu0 }
 0x14e   :  { %v614_v13 = vpop.f32.mrf.mxu1  ;;  %v2705_v15 = vpop.eup %2704  ;;  %v690_v16 = vpack.c.bf16 %v2703_v0, %v2703_v0  ;;  %1744 = vmatpush.bf16.msra.mxu1 %v2655_v5  ;;  %v602_v17 = vadd.f32 %v601_v60, %v184_v6  ;;  %v2661_v5 = vld [vmem:[#allocation8 + $0x310] sm:$0xff] }
 0x14f   :  { %v615_v18 = vadd.f32 %v614_v13, %v185_v8  ;;  %v691_v20 = vpack.c.bf16 %v2705_v15, %v2705_v15  ;;  %1707 = vmatpush.bf16.msrb.mxu2 %v2629_v9  ;;  %1720 = vmatpush.bf16.msrb.mxu3 %v2637_v10  ;;  %v2669_v6 = vld [vmem:[#allocation8 + $0x350] sm:$0xff]  ;;  %v2660_v8 = vld [vmem:[#allocation8 + $0x308] sm:$0xff]  ;;  %v2667_v10 = vld [vmem:[#allocation8 + $0x340] sm:$0xff] }
 0x150   :  { %2706 = vtanh.f32 %v602_v17  ;;  %1684 = vmatmul.bf16.vlgmr.msrb.gmra.mxu0 %v690_v16  ;;  %v2668_v9 = vld [vmem:[#allocation8 + $0x348] sm:$0xff] }
 0x151   :  { %2708 = vtanh.f32 %v615_v18  ;;  %1697 = vmatmul.bf16.vlgmr.msrb.gmra.mxu1 %v691_v20  ;;  %1732 = vmatpush.bf16.msra.mxu0 %v2646_v14 }
 0x152   :  { %1745 = vmatpush.bf16.msra.mxu1 %v2654_v19 }
 0x153   :  { %1708 = vmatpush.bf16.msrb.mxu2 %v2628_v21  ;;  %1721 = vmatpush.bf16.msrb.mxu3 %v2636_v22  ;;  %v2685_v22 = vld [vmem:[%s2971_s4] ss:$0 sm:$0xff]  ;;  %s2859_s4 = smov [#allocation10]  }
 0x154   :  { %v627_v29 = vpop.f32.mrf.mxu2  ;;  %v640_v30 = vpop.f32.mrf.mxu3  ;;  %s1806_s15 = sshll.u32 %s2859_s4, 4  ;;  %s1807_s15 = int_to_ptr.vmem [resolvable:$true] %s1806_s15 }
 0x155   :  { %v628_v33 = vadd.f32 %v627_v29, %v186_v23  ;;  %v641_v34 = vadd.f32 %v640_v30, %v187_v24  ;;  %1733 = vmatpush.bf16.msra.mxu0 %v2645_v25  ;;  %v603_v35 = vpop.f32.mrf.mxu0 }
 0x156   :  { %v616_v36 = vpop.f32.mrf.mxu1  ;;  %v2707_v38 = vpop.eup %2706  ;;  %1746 = vmatpush.bf16.msra.mxu1 %v2653_v26 }
 0x157   :  { %v2709_v40 = vpop.eup %2708  ;;  %v692_v41 = vpack.c.bf16 %v2707_v38, %v2707_v38  ;;  %2710 = vtanh.f32 %v628_v33  ;;  %1709 = vmatpush.bf16.msrb.mxu2 %v2627_v27  ;;  %1722 = vmatpush.bf16.msrb.mxu3 %v2635_v28 }
 0x158   :  { %v693_v42 = vpack.c.bf16 %v2709_v40, %v2709_v40  ;;  %2712 = vtanh.f32 %v641_v34 }
 0x159   :  { %1734 = vmatpush.bf16.msra.mxu0 %v2644_v37 }
 0x15a   :  { %1747 = vmatpush.bf16.msra.mxu1 %v2652_v39  ;;  %1710 = vmatmul.bf16.vlgmr.msrb.gmra.mxu2 %v692_v41 }
 0x15b   :  { %1754 = vmatpush.bf16.msra.mxu2 %v2666_v31  ;;  %1767 = vmatpush.bf16.msra.mxu3 %v2674_v32 }
 0x15c   :  { %1723 = vmatmul.bf16.vlgmr.msrb.gmra.mxu3 %v693_v42  ;;  %v629_v46 = vpop.f32.mrf.mxu2  ;;  %v642_v47 = vpop.f32.mrf.mxu3 }
 0x15d   :  { %v2711_v50 = vpop.eup %2710  ;;  %1735 = vmatpush.bf16.msra.mxu0 %v2643_v44  ;;  %v653_v51 = vpop.f32.mrf.mxu0 }
 0x15e   :  { %v666_v52 = vpop.f32.mrf.mxu1  ;;  %v2713_v53 = vpop.eup %2712  ;;  %v694_v54 = vpack.c.bf16 %v2711_v50, %v2711_v50  ;;  %1748 = vmatpush.bf16.msra.mxu1 %v2651_v45  ;;  %v654_v3 = vadd.f32 %v653_v51, %v188_v58 }
 0x15f   :  { %1755 = vmatpush.bf16.msra.mxu2 %v2665_v43  ;;  %1768 = vmatpush.bf16.msra.mxu3 %v2673_v7  ;;  %v695_v55 = vpack.c.bf16 %v2713_v53, %v2713_v53  ;;  %v667_v4 = vadd.f32 %v666_v52, %v189_v59 }
 0x160   :  { %1736 = vmatmul.bf16.vlgmr.msra.gmra.mxu0 %v694_v54  ;;  %2714 = vtanh.f32 %v654_v3 }
 0x161   :  { %1749 = vmatmul.bf16.vlgmr.msra.gmra.mxu1 %v695_v55  ;;  %2716 = vtanh.f32 %v667_v4 }
 0x163   :  { %1756 = vmatpush.bf16.msra.mxu2 %v2664_v48  ;;  %1769 = vmatpush.bf16.msra.mxu3 %v2672_v49 }
 0x165   :  { %v655_v63 = vpop.f32.mrf.mxu0 }
 0x166   :  { %v668_v1 = vpop.f32.mrf.mxu1  ;;  %v2715_v11 = vpop.eup %2714 }
 0x167   :  { %1757 = vmatpush.bf16.msra.mxu2 %v2663_v56  ;;  %1770 = vmatpush.bf16.msra.mxu3 %v2671_v57  ;;  %v2717_v12 = vpop.eup %2716  ;;  %v696_v0 = vpack.c.bf16 %v2715_v11, %v2715_v11 }
 0x168   :  { %v697_v60 = vpack.c.bf16 %v2717_v12, %v2717_v12 }
 0x16b   :  { %1758 = vmatpush.bf16.msra.mxu2 %v2662_v61  ;;  %1771 = vmatpush.bf16.msra.mxu3 %v2670_v62 }
 0x16f   :  { %1759 = vmatpush.bf16.msra.mxu2 %v2661_v5  ;;  %1772 = vmatpush.bf16.msra.mxu3 %v2669_v6 }
 0x173   :  { %1760 = vmatpush.bf16.msra.mxu2 %v2660_v8  ;;  %1773 = vmatpush.bf16.msra.mxu3 %v2668_v9 }
 0x177   :  { %1761 = vmatpush.bf16.msra.mxu2 %v2659_v2  ;;  %1774 = vmatpush.bf16.msra.mxu3 %v2667_v10 }
 0x17a   :  { %1762 = vmatmul.bf16.vlgmr.msra.gmra.mxu2 %v696_v0  ;;  %1775 = vmatmul.bf16.vlgmr.msra.gmra.mxu3 %v697_v60 }
 0x1bc   :  { %v1607_v13 = vpop.f32.mrf.mxu2 }
 0x1bd   :  { %v1620_v14 = vpop.f32.mrf.mxu3  ;;  %v1633_v15 = vpop.f32.mrf.mxu0  ;;  %v1608_v26 = vadd.f32 %v2685_v22, %v1607_v13 }
 0x1be   :  { %v1646_v16 = vpop.f32.mrf.mxu1 }
 0x1bf   :  { %v1621_v28 = vadd.f32 %v1620_v14, %v1608_v26 }
 0x1c1   :  { %v1634_v32 = vadd.f32 %v1633_v15, %v1621_v28 }
 0x1c3   :  { %v1647_v33 = vadd.f32 %v1646_v16, %v1634_v32 }
 0x1c4   :  { %v1609_v17 = vpop.f32.mrf.mxu2 }
 0x1c5   :  { %v1622_v18 = vpop.f32.mrf.mxu3  ;;  %v1635_v19 = vpop.f32.mrf.mxu0 }
 0x1c6   :  { %v1648_v20 = vpop.f32.mrf.mxu1 }
 0x1cc   :  { %v1659_v21 = vpop.f32.mrf.mxu2 }
 0x1cd   :  { %v1672_v23 = vpop.f32.mrf.mxu3  ;;  %v1685_v24 = vpop.f32.mrf.mxu0  ;;  %v1660_v37 = vadd.f32 %v1659_v21, %v1647_v33 }
 0x1ce   :  { %v1698_v25 = vpop.f32.mrf.mxu1 }
 0x1cf   :  { %v1673_v39 = vadd.f32 %v1672_v23, %v1660_v37 }
 0x1d1   :  { %v1686_v43 = vadd.f32 %v1685_v24, %v1673_v39 }
 0x1d3   :  { %v1699_v44 = vadd.f32 %v1698_v25, %v1686_v43 }
 0x1d4   :  { %v1661_v27 = vpop.f32.mrf.mxu2 }
 0x1d5   :  { %v1674_v29 = vpop.f32.mrf.mxu3  ;;  %v1687_v30 = vpop.f32.mrf.mxu0 }
 0x1d6   :  { %v1700_v31 = vpop.f32.mrf.mxu1 }
 0x1dd   :  { %v1711_v34 = vpop.f32.mrf.mxu2  ;;  %v1737_v36 = vpop.f32.mrf.mxu0 }
 0x1de   :  { %v1750_v38 = vpop.f32.mrf.mxu1  ;;  %v1712_v45 = vadd.f32 %v1711_v34, %v1699_v44 }
 0x1df   :  { %v1724_v35 = vpop.f32.mrf.mxu3 }
 0x1e0   :  { %v1725_v46 = vadd.f32 %v1724_v35, %v1712_v45 }
 0x1e2   :  { %v1738_v47 = vadd.f32 %v1737_v36, %v1725_v46 }
 0x1e4   :  { %v1751_v48 = vadd.f32 %v1750_v38, %v1738_v47 }
 0x1e5   :  { %v1713_v40 = vpop.f32.mrf.mxu2  ;;  %v1739_v42 = vpop.f32.mrf.mxu0 }
 0x1e6   :  { %v1752_v7 = vpop.f32.mrf.mxu1 }
 0x1e7   :  { %v1726_v41 = vpop.f32.mrf.mxu3 }
 0x1fd   :  { %v1763_v49 = vpop.f32.mrf.mxu2  ;;  %v1776_v50 = vpop.f32.mrf.mxu3 }
 0x1fe   :  { %v1764_v51 = vadd.f32 %v1763_v49, %v1751_v48 }
 0x200   :  { %v1777_v52 = vadd.f32 %v1776_v50, %v1764_v51 }
 0x202   :  { %v2506_v53 = vmul.f32 -1.442695, %v1777_v52 }
 0x204   :  { %2718 = vpow2.f32 %v2506_v53 }
 0x205   :  { %v1765_v54 = vpop.f32.mrf.mxu2  ;;  %v1778_v55 = vpop.f32.mrf.mxu3 }
 0x20a   :  { %v2719_v56 = vpop.eup %2718 }
 0x20b   :  { %v1783_v57 = vadd.f32 1.0, %v2719_v56 }
 0x20d   :  { %2720 = vrcp.f32 %v1783_v57  ;;  %v1795_v62 = vand.u32 2147483648, %v1783_v57  ;;  %v1793_v1 = vand.u32 2147483647, %v1783_v57  ;;  %vm1789_vm7 = vweird.f32 %v1783_v57 }
 0x20f   :  { %v1796_v4 = vor.u32 1.1754944e-38, %v1795_v62  ;;  %vm1794_vm9 = vcmp.eq.f32.partialorder %v1793_v1, 8.507059e+37 }
 0x213   :  { %v2721_v58 = vpop.eup %2720 }
 0x214   :  { %v1785_v59 = vmul.f32 %v2721_v58, %v1783_v57  ;;  %vm1790_vm6 = vweird.f32 %v2721_v58 }
 0x215   :  { %vm1791_vm8 = vmor %vm1789_vm7, %vm1790_vm6 }
 0x216   :  { %v1786_v61 = vsub.f32 1.0, %v1785_v59 }
 0x218   :  { %v1787_v63 = vmul.f32 %v2721_v58, %v1786_v61 }
 0x21a   :  { %v1788_v3 = vadd.f32 %v2721_v58, %v1787_v63 }
 0x21c   :  { %v1792_v5 = vsel %vm1791_vm8, %v2721_v58, %v1788_v3 }
 0x21d   :  { %v1797_v6 = vsel %vm1794_vm9, %v1796_v4, %v1792_v5 }
 0x21e   :  { %v1799_v8 = vmul.f32 6.2831855, %v1797_v6 }
 0x220   :  { %1800 = vst [vmem:[#allocation10] sm:$0x3] %v1799_v8 }
 0x221   :  { %1811 = dma.vmem_to_hbm [thread:$0]  %s1807_s15, 32, %s1809_s18, [#allocation4]  }
 0x222   :  { %2848 = dma.done.wait [#allocation4], 32  }
 0x223   :  { %2849 = vsyncadd [#allocation4], 4294967264 }
 0x224   :  { %1816 = vsyncpa [#allocation3], 1 }
 0x225   :  { %1817 = vsyncpa [#allocation6], 1 }
 0x226   :  { %1818 = vsyncpa [#allocation9], 1 }
 0x227   :  { %1819 = vsyncpa [#allocation4], 1 }

</bundles_post_ra>
